<compile_context>
chip_gen: v5e
topology: v5e:2x2
jax: 0.10.0
libtpu: 0.0.40
codegen_flags: <defaults>
</compile_context>

<pallas_src>
import functools

import jax
import jax.numpy as jnp
from jax import lax
from jax.experimental import pallas as pl
from jax.experimental.pallas import tpu as pltpu


def _upscale_kernel(x_ref, w_ref, b_ref, alpha_ref, o_ref, *, Ho, KH):
    """One batch element per grid step.

    x_ref:     (1, Hp, Wp*Cin)        padded input, lanes = (W, Cin)      (VMEM)
    w_ref:     (KH*Wp*Cin, Wo*Cout)   block-Toeplitz conv weights          (VMEM, grid-invariant)
    b_ref:     (1, Wo*Cout)           bias tiled along W                   (VMEM, grid-invariant)
    alpha_ref: (1, 1)                 PReLU alpha                          (SMEM scalar)
    o_ref:     (1, Ho, Wo*Cout)       conv+bias+PReLU output, lane-dense   (VMEM)
    """
    x = x_ref[0]                                                        # (Hp, Wp*Cin)

    # im2row: stack the KH shifted row-bands along the contraction (lane) axis.
    xb = jnp.concatenate([x[i:i + Ho, :] for i in range(KH)], axis=1)   # (Ho, KH*Wp*Cin)

    # Single fused MXU matmul over all conv taps, f32 accumulation.
    acc = jnp.dot(xb, w_ref[...], preferred_element_type=jnp.float32)   # (Ho, Wo*Cout)
    acc = acc + b_ref[...]

    alpha = alpha_ref[0, 0]
    y = jnp.where(acc > 0, acc, alpha * acc)                            # PReLU (shared alpha)

    o_ref[0] = y.astype(o_ref.dtype)


def upscale_layer_forward(x_nchw, weight, bias, alpha, *, padding, upscale_factor):
    """Forward pass matching PyTorch UpscaleLayer.

    x_nchw: (N, Cin, H, W)      float32
    weight: (Cout, Cin, KH, KW) float32   (PyTorch Conv2d layout)
    bias:   (Cout,)             float32
    alpha:  scalar              float32   (nn.PReLU single parameter)
    returns (N, Cout // r^2, H*r, W*r) in NCHW, float32.
    """
    N, Cin, H, W = x_nchw.shape
    Cout, _, KH, KW = weight.shape
    r = upscale_factor
    assert Cout % (r * r) == 0

    Hp, Wp = H + 2 * padding, W + 2 * padding
    Ho, Wo = Hp - KH + 1, Wp - KW + 1                                   # conv output size

    # --- glue (tiny, fused by XLA): NCHW -> NHWC, spatial pad, fold (W, Cin) into lanes ---
    # TODO(synk): accept NHWC / pre-padded input to drop this extra HBM pass on the input.
    x_nhwc = jnp.transpose(x_nchw, (0, 2, 3, 1))                        # (N, H, W, Cin)
    xp = jnp.pad(x_nhwc, ((0, 0), (padding, padding), (padding, padding), (0, 0)))
    x2d = xp.reshape(N, Hp, Wp * Cin)                                   # (N, Hp, Wp*Cin)

    # --- block-Toeplitz weight: one matmul computes the whole KHxKW conv ---
    # Wbig[i*Wp*Cin + wi*Cin + ci, wo*Cout + co] = weight[co, ci, i, wi - wo]  (0 <= wi-wo < KW)
    w_hwio = jnp.transpose(weight, (2, 3, 1, 0)).astype(jnp.float32)    # (KH, KW, Cin, Cout)
    sel = jnp.stack([jnp.eye(Wp, Wo, k=-j, dtype=jnp.float32)
                     for j in range(KW)])                               # (KW, Wp, Wo)
    w_big = jnp.einsum('jvw,ijco->ivcwo', sel, w_hwio)                  # (KH, Wp, Cin, Wo, Cout)
    w_big = w_big.reshape(KH * Wp * Cin, Wo * Cout)                     # (216, 256)

    b_big = jnp.tile(bias.astype(jnp.float32), Wo).reshape(1, Wo * Cout)
    alpha_arr = jnp.asarray(alpha, jnp.float32).reshape(1, 1)

    kernel = functools.partial(_upscale_kernel, Ho=Ho, KH=KH)

    y2d = pl.pallas_call(
        kernel,
        out_shape=jax.ShapeDtypeStruct((N, Ho, Wo * Cout), jnp.float32),
        grid_spec=pltpu.PrefetchScalarGridSpec(
            num_scalar_prefetch=0,
            grid=(N,),
            in_specs=[
                pl.BlockSpec((1, Hp, Wp * Cin), lambda n: (n, 0, 0)),
                pl.BlockSpec((KH * Wp * Cin, Wo * Cout), lambda n: (0, 0)),
                pl.BlockSpec((1, Wo * Cout), lambda n: (0, 0)),
                pl.BlockSpec(memory_space=pltpu.MemorySpace.SMEM),
            ],
            out_specs=pl.BlockSpec((1, Ho, Wo * Cout), lambda n: (n, 0, 0)),
        ),
        compiler_params=pltpu.CompilerParams(
            dimension_semantics=("parallel",)),
    )(x2d, w_big, b_big, alpha_arr)

    # --- glue: split lanes back into (Wo, Cout), then PixelShuffle (pure permutation) ---
    y_nhwc = y2d.reshape(N, Ho, Wo, Cout)
    C_ps = Cout // (r * r)
    y = y_nhwc.reshape(N, Ho, Wo, C_ps, r, r)                           # split cout -> (c, dr, dc)
    y = jnp.transpose(y, (0, 3, 1, 4, 2, 5))                            # (N, C_ps, Ho, r, Wo, r)
    return y.reshape(N, C_ps, Ho * r, Wo * r)


def _reference(x_nchw, weight, bias, alpha, *, padding, upscale_factor):
    """Pure-JAX reference for correctness checking."""
    y = lax.conv_general_dilated(
        x_nchw, weight, window_strides=(1, 1),
        padding=[(padding, padding), (padding, padding)],
        dimension_numbers=("NCHW", "OIHW", "NCHW"))
    y = y + bias[None, :, None, None]
    N, Cout, H, W = y.shape
    r = upscale_factor
    C_ps = Cout // (r * r)
    y = y.reshape(N, C_ps, r, r, H, W)
    y = jnp.transpose(y, (0, 1, 4, 2, 5, 3)).reshape(N, C_ps, H * r, W * r)
    return jnp.where(y > 0, y, alpha * y)


if __name__ == "__main__":
    # Module config (small, consistent with the PyTorch module's constructor)
    in_channels = 4
    hidden_channels = 16     # conv1 out channels; must be divisible by r^2
    kernel_size = 3
    upscale_factor = 2
    padding = 1

    N, H, W = 2, 16, 16

    key = jax.random.PRNGKey(0)
    k_x, k_w, k_b = jax.random.split(key, 3)

    x = jax.random.normal(k_x, (N, in_channels, H, W), jnp.float32)
    fan_in = in_channels * kernel_size * kernel_size
    weight = jax.random.normal(
        k_w, (hidden_channels, in_channels, kernel_size, kernel_size),
        jnp.float32) * (1.0 / fan_in) ** 0.5
    bias = jax.random.normal(k_b, (hidden_channels,), jnp.float32) * 0.1
    alpha = jnp.float32(0.25)  # nn.PReLU() default single parameter

    out = upscale_layer_forward(x, weight, bias, alpha,
                                padding=padding, upscale_factor=upscale_factor)
    out = jax.block_until_ready(out)

    ref = _reference(x, weight, bias, alpha,
                     padding=padding, upscale_factor=upscale_factor)
    assert out.shape == (N, hidden_channels // upscale_factor ** 2,
                         H * upscale_factor, W * upscale_factor)
    assert jnp.allclose(out, ref, atol=1e-4, rtol=1e-4)

    print("KERNEL_OK")
</pallas_src>

<mosaic_0001>
module attributes {stable_mosaic.version = 11 : i64} {
  func.func @_upscale_kernel(%arg0: i32, %arg1: memref<1x18x72xf32, #tpu.memory_space<vmem>>, %arg2: memref<216x256xf32, #tpu.memory_space<vmem>>, %arg3: memref<1x256xf32, #tpu.memory_space<vmem>>, %arg4: memref<1x1xf32, #tpu.memory_space<smem>>, %arg5: memref<1x16x256xf32, #tpu.memory_space<vmem>>) attributes {dimension_semantics = [#tpu.dimension_semantics<parallel>], iteration_bounds = array<i64: 2>, scalar_prefetch = 0 : i64, scratch_operands = 0 : i64, tpu.core_type = #tpu.core_type<tc>, window_params = [{transform_indices = @transform_0, window_bounds = array<i64: 1, 18, 72>}, {pipeline_mode = #tpu.pipeline_mode<synchronous>, transform_indices = @transform_1, window_bounds = array<i64: 216, 256>}, {pipeline_mode = #tpu.pipeline_mode<synchronous>, transform_indices = @transform_2, window_bounds = array<i64: 1, 256>}, {transform_indices = @transform_3, window_bounds = array<i64: 1, 1>}, {transform_indices = @transform_4, window_bounds = array<i64: 1, 16, 256>}]} {
    %c0 = arith.constant 0 : index
    %c0_0 = arith.constant 0 : index
    %c0_1 = arith.constant 0 : index
    %0 = vector.load %arg1[%c0, %c0_0, %c0_1] : memref<1x18x72xf32, #tpu.memory_space<vmem>>, vector<1x18x72xf32>
    %1 = vector.shape_cast %0 : vector<1x18x72xf32> to vector<18x72xf32>
    %2 = vector.extract_strided_slice %1 {offsets = [0, 0], sizes = [16, 72], strides = [1, 1]} : vector<18x72xf32> to vector<16x72xf32>
    %3 = vector.extract_strided_slice %1 {offsets = [1, 0], sizes = [16, 72], strides = [1, 1]} : vector<18x72xf32> to vector<16x72xf32>
    %4 = vector.extract_strided_slice %1 {offsets = [2, 0], sizes = [16, 72], strides = [1, 1]} : vector<18x72xf32> to vector<16x72xf32>
    %5 = tpu.concatenate %2, %3, %4 in 1 : vector<16x72xf32>, vector<16x72xf32>, vector<16x72xf32> -> vector<16x216xf32>
    %c0_2 = arith.constant 0 : index
    %c0_3 = arith.constant 0 : index
    %6 = vector.load %arg2[%c0_2, %c0_3] : memref<216x256xf32, #tpu.memory_space<vmem>>, vector<216x256xf32>
    %cst = arith.constant dense<0.000000e+00> : vector<16x256xf32>
    %7 = tpu.matmul %5, %6, %cst {dimension_numbers = #tpu.dot_dimension_numbers<[1], [0], [0], [1], [0, 0, 1, 1], [], []>} : vector<16x216xf32>, vector<216x256xf32>, vector<16x256xf32> -> vector<16x256xf32>
    %c0_4 = arith.constant 0 : index
    %c0_5 = arith.constant 0 : index
    %8 = vector.load %arg3[%c0_4, %c0_5] : memref<1x256xf32, #tpu.memory_space<vmem>>, vector<1x256xf32>
    %9 = vector.broadcast %8 : vector<1x256xf32> to vector<16x256xf32>
    %10 = arith.addf %7, %9 : vector<16x256xf32>
    %c0_6 = arith.constant 0 : index
    %c0_7 = arith.constant 0 : index
    %11 = memref.load %arg4[%c0_6, %c0_7] : memref<1x1xf32, #tpu.memory_space<smem>>
    %cst_8 = arith.constant 0.000000e+00 : f32
    %12 = vector.broadcast %cst_8 : f32 to vector<16x256xf32>
    %13 = arith.cmpf ogt, %10, %12 : vector<16x256xf32>
    %14 = vector.broadcast %11 : f32 to vector<16x256xf32>
    %15 = arith.mulf %14, %10 : vector<16x256xf32>
    %16 = arith.select %13, %10, %15 : vector<16x256xi1>, vector<16x256xf32>
    %c0_9 = arith.constant 0 : index
    %c0_10 = arith.constant 0 : index
    %c0_11 = arith.constant 0 : index
    %17 = vector.load %arg5[%c0_9, %c0_10, %c0_11] : memref<1x16x256xf32, #tpu.memory_space<vmem>>, vector<1x16x256xf32>
    %18 = vector.shape_cast %17 : vector<1x16x256xf32> to vector<16x256xf32>
    %19 = vector.shape_cast %16 : vector<16x256xf32> to vector<1x16x256xf32>
    tpu.vector_store %arg5[%c0_9, %c0_10, %c0_11], %19 {strides = array<i32>} : memref<1x16x256xf32, #tpu.memory_space<vmem>>, vector<1x16x256xf32>,
    return
  }
  func.func @transform_0(%arg0: i32) -> (i32, i32, i32) {
    %c0_i32 = arith.constant 0 : i32
    %c0_i32_0 = arith.constant 0 : i32
    %c0_i32_1 = arith.constant 0 : i32
    return %arg0, %c0_i32, %c0_i32_0 : i32, i32, i32
  }
  func.func @transform_1(%arg0: i32) -> (i32, i32) {
    %c0_i32 = arith.constant 0 : i32
    %c0_i32_0 = arith.constant 0 : i32
    %c0_i32_1 = arith.constant 0 : i32
    return %c0_i32, %c0_i32_0 : i32, i32
  }
  func.func @transform_2(%arg0: i32) -> (i32, i32) {
    %c0_i32 = arith.constant 0 : i32
    %c0_i32_0 = arith.constant 0 : i32
    %c0_i32_1 = arith.constant 0 : i32
    return %c0_i32, %c0_i32_0 : i32, i32
  }
  func.func @transform_3(%arg0: i32) -> (i32, i32) {
    %c0_i32 = arith.constant 0 : i32
    %c0_i32_0 = arith.constant 0 : i32
    %c0_i32_1 = arith.constant 0 : i32
    return %c0_i32, %c0_i32_0 : i32, i32
  }
  func.func @transform_4(%arg0: i32) -> (i32, i32, i32) {
    %c0_i32 = arith.constant 0 : i32
    %c0_i32_0 = arith.constant 0 : i32
    %c0_i32_1 = arith.constant 0 : i32
    return %arg0, %c0_i32, %c0_i32_0 : i32, i32, i32
  }
}

</mosaic_0001>

<bundles_post_ra>
// kernel: tpu_custom_call.1
= control target key start
LH: loop header
LB: loop body
LE: loop exit
PB: predicated region body
PF: predicated region fallthrough
CT: control target
= control target key end

     0   :  { %s838_s0 = inlined_call_operand.vmem [shape: f32[2,18,72], index: 0, kind: input, shape index: {}]   ;;  %s839_s1 = inlined_call_operand.hbm [shape: f32[216,256], index: 1, kind: input, shape index: {}]   ;;  %s840_s2 = inlined_call_operand.vmem [shape: f32[1,256], index: 2, kind: input, shape index: {}]   ;;  %s841_s3 = inlined_call_operand.<no memory space> [shape: f32[1,1], index: 3, kind: input, shape index: {}]   ;;  %s842_s4 = inlined_call_operand.hbm [shape: f32[2,16,256], index: 4, kind: output, shape index: {}]  }
   0x1   :  { %9 = sst [smem:[#allocation2]] %s841_s3 }
   0x2   :  { %10 = vsyncpa [#allocation4], 0 }
   0x3   :  { %11 = vsyncpa [#allocation5], 0 }
   0x4   :  { %13 = vsyncpa [#allocation5 + $0x1], 0  ;;  %s723_s17 = smov 0   ;;  %s725_s18 = smov 0  }
   0x5   :  { %s727_s19 = smov 0   ;;  %s729_s20 = smov 0  }
   0x6 LB: > { %s744_s3 = sadd.s32 4294967295, %s687_s20   ;;  %s517_s21 = sadd.s32 4294967294, %s687_s20   ;;  %s687_s20 = sphi %s729_s20, %s848_s20   ;;  %s683_s19 = sphi %s727_s19, %s847_s19   ;;  %s679_s18 = sphi %s725_s18, %s846_s18   ;;  %s675_s17 = sphi %s723_s17, %s845_s17  }
   0x7   : > { %s748_s22 = sadd.s32 1, %s687_s20   ;;  %s115_s23 = sadd.s32 1, %s683_s19 }
   0x8   : > { %s112_s24 = ssub.s32 %s687_s20, %s748_s22  ;;  %p125_p0 = scmp.ne.s32.totalorder %s683_s19, %s679_s18 }
   0x9   : > { %p113_p1 = scmp.eq.s32.totalorder %s112_s24, 0  ;;  %p126_p2 = scmp.eq.s32.totalorder %s744_s3, 1 }
   0xa   : > { %p131_p3 = scmp.ne.s32.totalorder %s679_s18, %s675_s17  ;;  %p132_p4 = scmp.eq.s32.totalorder %s517_s21, 1 }
   0xb   : > { %s759_s25 = scalar_select %p113_p1, %s683_s19, %s115_s23  }
   0xc   : > { %p761_p5 = por %p126_p2, %p125_p0  ;;  %p765_p6 = por %p132_p4, %p131_p3 }
   0xd   : > { %p518_p7 = scmp.ge.s32.totalorder %s687_s20, 1  ;;  %p139_p8 = scmp.lt.s32.totalorder %s687_s20, 3 }
   0xe   : > { %p550_p9 = scmp.eq.s32.totalorder %s744_s3, 0  ;;  %s150_s30 = sshll.u32 %s839_s1, 4  ;;  %s151_s30 = int_to_ptr.hbm [resolvable:$true] %s150_s30 }
   0xf   : > { %p140_p10 = pnand %p518_p7, %p139_p8  ;;  %s689_s5 = smov [#allocation3]  }
  0x10   : > { %s152_s6 = sshll.u32 %s689_s5, 4  ;;  %s690_s7 = smov 256   ;;  %s153_s6 = int_to_ptr.vmem [resolvable:$true] %s152_s6 }
  0x11   : > { %p542_p11 = pneg %p140_p10  ;;  %s691_s8 = smov 16  }
  0x12   : > { %182 = sbr.rel (%p140_p10) target bundleno = 309 (0x135), region = 36 }
  0x13   : > { %p543_p12 = pnand %p550_p9, %p542_p11 }
  0x15   : > { %545 = dma.hbm_to_vmem [thread:$0]  (!%p543_p12), %s151_s30, 6912, %s153_s6, [#allocation4], %s690_s7, %s690_s7, %s691_s8  }
  0x17   : > { %666 = dma.done.wait (%p550_p9), [#allocation4], 6912  }
  0x18   : > { %668 = vsyncadd (%p550_p9), [#allocation4], 4294960384  ;;  %p209_p13 = scmp.lt.s32.totalorder %s744_s3, 1  ;;  %vm220_vm0 = vcmask 1046528   ;;  %v280_v6 = vld [vmem:[#allocation3 + $0xf0] sm:$0xff]  ;;  %v281_v7 = vld [vmem:[#allocation3 + $0xf8] sm:$0xff] }
  0x19   : > { %317 = vmatpush.msra.mxu0 %v280_v6  ;;  %363 = vmatpush.msra.mxu2 %v281_v7  ;;  %v278_v8 = vld [vmem:[#allocation3 + $0xe0] sm:$0xff]  ;;  %v279_v9 = vld [vmem:[#allocation3 + $0xe8] sm:$0xff]  ;;  %s692_s14 = smov 72   ;;  %v276_v12 = vld [vmem:[#allocation3 + $0xd0] sm:$0xff]  ;;  %vm232_vm1 = vcmask 1045504   ;;  %s693_s15 = smov 16  }
  0x1a   : > { %s210_s9 = scalar_select %p209_p13, %s744_s3, 1  ;;  %v277_v13 = vld [vmem:[#allocation3 + $0xd8] sm:$0xff]  ;;  %v274_v17 = vld [vmem:[#allocation3 + $0xc0] sm:$0xff]  ;;  %v275_v18 = vld [vmem:[#allocation3 + $0xc8] sm:$0xff]  ;;  %vm244_vm2 = vcmask 588800   ;;  %vm247_vm3 = vcmask 130048  }
  0x1b   : > { %318 = vmatpush.msra.mxu0 %v278_v8  ;;  %364 = vmatpush.msra.mxu2 %v279_v9  ;;  %v302_v19 = vld [vmem:[#allocation3 + $0x1a0] sm:$0xff]  ;;  %v272_v20 = vld [vmem:[#allocation3 + $0xb0] sm:$0xff]  ;;  %v273_v21 = vld [vmem:[#allocation3 + $0xb8] sm:$0xff]  ;;  %vm310_vm4 = vcmask 719872   ;;  %s409_s23 = sld [smem:[#allocation2]]  ;;  %s206_s24 = sand.u32 1, %s679_s18  }
  0x1c   : > { %s535_s10 = smul.u32 24, %s210_s9  ;;  %345 = vmatpush.msra.mxu1 %v302_v19  ;;  %v303_v22 = vld [vmem:[#allocation3 + $0x1a8] sm:$0xff]  ;;  %v300_v25 = vld [vmem:[#allocation3 + $0x190] sm:$0xff]  ;;  %v270_v26 = vld [vmem:[#allocation3 + $0xa0] sm:$0xff]  ;;  %s523_s28 = sshll.u32 %s206_s24, 5 }
  0x1d   : > { %319 = vmatpush.msra.mxu0 %v276_v12  ;;  %365 = vmatpush.msra.mxu2 %v277_v13  ;;  %v271_v27 = vld [vmem:[#allocation3 + $0xa8] sm:$0xff]  ;;  %v301_v28 = vld [vmem:[#allocation3 + $0x198] sm:$0xff]  ;;  %v298_v29 = vld [vmem:[#allocation3 + $0x180] sm:$0xff]  ;;  %s208_s29 = scalar_lea.vmem [#allocation6], %s523_s28  ;;  %s534_s30 = sshll.u32 %s744_s3, 5 }
  0x1e   : > { %s213_s13 = scalar_lea.vmem %s838_s0, %s535_s10  ;;  %391 = vmatpush.msra.mxu3 %v303_v22  ;;  %346 = vmatpush.msra.mxu1 %v300_v25  ;;  %v268_v30 = vld [vmem:[#allocation3 + $0x90] sm:$0xff]  ;;  %v269_v31 = vld [vmem:[#allocation3 + $0x98] sm:$0xff]  ;;  %v299_v32 = vld [vmem:[#allocation3 + $0x188] sm:$0xff]  ;;  %s439_s7 = scalar_lea.hbm %s842_s4, %s534_s30 }
  0x1f   : > { %v786_v0 = vld [vmem:[%s213_s13 + $0x8] sm:$0xff]  ;;  %v216_v1 = vld [vmem:[%s213_s13 + $0x10] sm:$0x3]  ;;  %v788_v2 = vld [vmem:[%s213_s13] sm:$0xff]  ;;  %320 = vmatpush.msra.mxu0 %v274_v17  ;;  %366 = vmatpush.msra.mxu2 %v275_v18  ;;  %s440_s8 = sshll.u32 %s208_s29, 4  ;;  %s442_s9 = sshll.u32 %s439_s7, 4  ;;  %s441_s8 = int_to_ptr.vmem [resolvable:$true] %s440_s8  ;;  %s443_s9 = int_to_ptr.hbm [resolvable:$true] %s442_s9 }
  0x20   : > { %v222_v3 = vrot.slane %v786_v0, 1  ;;  %v224_v4 = vrot.slane %v216_v1, 1  ;;  %v221_v5 = vrot.slane %v788_v2, 1  ;;  %v234_v14 = vrot.slane %v786_v0, 2  ;;  %v296_v33 = vld [vmem:[#allocation3 + $0x170] sm:$0xff]  ;;  %v266_v34 = vld [vmem:[#allocation3 + $0x80] sm:$0xff]  ;;  %392 = vmatpush.msra.mxu3 %v301_v28  ;;  %347 = vmatpush.msra.mxu1 %v298_v29 }
  0x21   : > { %v236_v15 = vrot.slane %v216_v1, 2  ;;  %v233_v16 = vrot.slane %v788_v2, 2  ;;  %321 = vmatpush.msra.mxu0 %v272_v20  ;;  %367 = vmatpush.msra.mxu2 %v273_v21  ;;  %v267_v35 = vld [vmem:[#allocation3 + $0x88] sm:$0xff]  ;;  %v297_v36 = vld [vmem:[#allocation3 + $0x178] sm:$0xff]  ;;  %v294_v37 = vld [vmem:[#allocation3 + $0x160] sm:$0xff]  ;;  %s428_s3 = scalar_lea.sflag [#allocation5], %s206_s24 }
  0x22   : > { %v225_v10 = vsel %vm220_vm0, %v222_v3, %v224_v4  ;;  %v223_v11 = vsel %vm220_vm0, %v221_v5, %v222_v3  ;;  %v264_v38 = vld [vmem:[#allocation3 + $0x70] sm:$0xff]  ;;  %v265_v39 = vld [vmem:[#allocation3 + $0x78] sm:$0xff]  ;;  %393 = vmatpush.msra.mxu3 %v299_v32  ;;  %348 = vmatpush.msra.mxu1 %v296_v33  ;;  %v295_v40 = vld [vmem:[#allocation3 + $0x168] sm:$0xff]  ;;  %s635_s10 = sshra.s32 %s443_s9, 4  ;;  %s636_s10 = int_to_ptr.hbm [resolvable:$true] %s635_s10 }
  0x23   : > { %228 = vrot.lane.b32.xlu1 %v225_v10, %s692_s14  ;;  %226 = vrot.lane.b32.xlu0 %v223_v11, %s692_s14  ;;  %v237_v23 = vsel %vm232_vm1, %v234_v14, %v236_v15  ;;  %v235_v24 = vsel %vm232_vm1, %v233_v16, %v234_v14  ;;  %v292_v41 = vld [vmem:[#allocation3 + $0x150] sm:$0xff]  ;;  %v262_v42 = vld [vmem:[#allocation3 + $0x60] sm:$0xff]  ;;  %v263_v43 = vld [vmem:[#allocation3 + $0x68] sm:$0xff]  ;;  %v414_v16 = vstv %s409_s23  ;;  %s637_s11 = scalar_lea.hbm %s636_s10, 32  ;;  %s641_s14 = scalar_lea.hbm %s842_s4, 64 }
  0x24   : > { %322 = vmatpush.msra.mxu0 %v270_v26  ;;  %368 = vmatpush.msra.mxu2 %v271_v27  ;;  %v293_v44 = vld [vmem:[#allocation3 + $0x158] sm:$0xff]  ;;  %v260_v45 = vld [vmem:[#allocation3 + $0x50] sm:$0xff]  ;;  %v258_v47 = vld [vmem:[#allocation3 + $0x40] sm:$0xff]  ;;  %p638_p0 = scmp.ne.s32.totalorder %s636_s10, %s637_s11  ;;  %p642_p3 = scmp.lt.s32.totalorder %s636_s10, %s842_s4 }
  0x25   : > { %394 = vmatpush.msra.mxu3 %v297_v36  ;;  %349 = vmatpush.msra.mxu1 %v294_v37  ;;  %v261_v46 = vld [vmem:[#allocation3 + $0x58] sm:$0xff]  ;;  %v259_v48 = vld [vmem:[#allocation3 + $0x48] sm:$0xff]  ;;  %v256_v49 = vld [vmem:[#allocation3 + $0x30] sm:$0xff]  ;;  %p643_p4 = scmp.lt.s32.totalorder %s641_s14, %s637_s11 }
  0x26   : > { %323 = vmatpush.msra.mxu0 %v268_v30  ;;  %369 = vmatpush.msra.mxu2 %v269_v31  ;;  %v257_v50 = vld [vmem:[#allocation3 + $0x38] sm:$0xff]  ;;  %v254_v51 = vld [vmem:[#allocation3 + $0x20] sm:$0xff]  ;;  %v255_v52 = vld [vmem:[#allocation3 + $0x28] sm:$0xff]  ;;  %p639_p1 = pnand %p638_p0, %p761_p5 }
  0x27   : > { %395 = vmatpush.msra.mxu3 %v295_v40  ;;  %350 = vmatpush.msra.mxu1 %v292_v41  ;;  %v252_v53 = vld [vmem:[#allocation3 + $0x10] sm:$0xff]  ;;  %v253_v54 = vld [vmem:[#allocation3 + $0x18] sm:$0xff]  ;;  %v250_v55 = vld [vmem:[#allocation3] sm:$0xff]  ;;  %p644_p7 = por %p643_p4, %p642_p3 }
  0x28   : > { %324 = vmatpush.msra.mxu0 %v266_v34  ;;  %370 = vmatpush.msra.mxu2 %v267_v35  ;;  %v290_v56 = vld [vmem:[#allocation3 + $0x140] sm:$0xff]  ;;  %v251_v57 = vld [vmem:[#allocation3 + $0x8] sm:$0xff]  ;;  %v288_v59 = vld [vmem:[#allocation3 + $0x130] sm:$0xff]  ;;  %p640_p2 = pneg %p639_p1 }
  0x29   : > { %396 = vmatpush.msra.mxu3 %v293_v44  ;;  %351 = vmatpush.msra.mxu1 %v290_v56  ;;  %v291_v58 = vld [vmem:[#allocation3 + $0x148] sm:$0xff]  ;;  %v289_v60 = vld [vmem:[#allocation3 + $0x138] sm:$0xff]  ;;  %v286_v61 = vld [vmem:[#allocation3 + $0x120] sm:$0xff] }
  0x2a   : > { %325 = vmatpush.msra.mxu0 %v264_v38  ;;  %371 = vmatpush.msra.mxu2 %v265_v39  ;;  %v287_v62 = vld [vmem:[#allocation3 + $0x128] sm:$0xff]  ;;  %v284_v63 = vld [vmem:[#allocation3 + $0x110] sm:$0xff]  ;;  %v285_v1 = vld [vmem:[#allocation3 + $0x118] sm:$0xff]  ;;  %p645_p8 = pnand %p644_p7, %p640_p2 }
  0x2b   : > { %240 = vrot.lane.b32.xlu1 %v237_v23, %s693_s15  ;;  %238 = vrot.lane.b32.xlu0 %v235_v24, %s693_s15  ;;  %v282_v3 = vld [vmem:[#allocation3 + $0x100] sm:$0xff]  ;;  %v283_v4 = vld [vmem:[#allocation3 + $0x108] sm:$0xff] }
  0x2c   : > { %326 = vmatpush.msra.mxu0 %v262_v42  ;;  %372 = vmatpush.msra.mxu2 %v263_v43 }
  0x2d   : > { %397 = vmatpush.msra.mxu3 %v291_v58  ;;  %352 = vmatpush.msra.mxu1 %v288_v59 }
  0x2e   : > { %327 = vmatpush.msra.mxu0 %v260_v45  ;;  %373 = vmatpush.msra.mxu2 %v261_v46 }
  0x2f   : > { %398 = vmatpush.msra.mxu3 %v289_v60  ;;  %353 = vmatpush.msra.mxu1 %v286_v61 }
  0x30   : > { %328 = vmatpush.msra.mxu0 %v258_v47  ;;  %374 = vmatpush.msra.mxu2 %v259_v48 }
  0x31   : > { %399 = vmatpush.msra.mxu3 %v287_v62  ;;  %354 = vmatpush.msra.mxu1 %v284_v63 }
  0x32   : > { %329 = vmatpush.msra.mxu0 %v256_v49  ;;  %375 = vmatpush.msra.mxu2 %v257_v50 }
  0x33   : > { %400 = vmatpush.msra.mxu3 %v285_v1  ;;  %355 = vmatpush.msra.mxu1 %v282_v3 }
  0x34   : > { %330 = vmatpush.msra.mxu0 %v254_v51  ;;  %376 = vmatpush.msra.mxu2 %v255_v52 }
  0x35   : > { %401 = vmatpush.msra.mxu3 %v283_v4 }
  0x36   : > { %331 = vmatpush.msra.mxu0 %v252_v53  ;;  %377 = vmatpush.msra.mxu2 %v253_v54 }
  0x38   : > { %332 = vmatpush.msra.mxu0 %v250_v55  ;;  %378 = vmatpush.msra.mxu2 %v251_v57 }
  0x95   : > { %v227_v5 = vpop.permute.xlu0 %226  ;;  %v229_v7 = vpop.permute.xlu1 %228 }
  0x96   : > { %v245_v6 = vsel %vm244_vm2, %v788_v2, %v227_v5  ;;  %v246_v8 = vsel %vm244_vm2, %v786_v0, %v229_v7  ;;  %v304_v2 = vld [vmem:[%s840_s2] sm:$0x3] }
  0x97   : > { %333 = vmatmul.f32.vlgmr.msra.gmra.mxu0 %v245_v6  ;;  %379 = vmatmul.f32.vlgmr.msra.gmra.mxu2 %v245_v6  ;;  %v306_v0 = vperm.slane %v304_v2, 0  ;;  %v307_v19 = vperm.slane %v304_v2, 1 }
  0x9d   : > { %v239_v9 = vpop.permute.xlu0 %238  ;;  %v241_v11 = vpop.permute.xlu1 %240 }
  0x9e   : > { %v248_v10 = vsel %vm247_vm3, %v227_v5, %v239_v9  ;;  %v249_v12 = vsel %vm247_vm3, %v229_v7, %v241_v11 }
  0x9f   : > { %336 = vmatmul.f32.gmra.mxu0 %v246_v8  ;;  %525 = vmatmul.msk.f32.vlgmr.msra.gmra.mxu1 %vm310_vm4, %v248_v10 }
  0xa0   : > { %382 = vmatmul.f32.gmra.mxu2 %v246_v8  ;;  %527 = vmatmul.msk.f32.vlgmr.msra.gmra.mxu3 %vm310_vm4, %v248_v10 }
  0xa7   : > { %526 = vmatmul.msk.f32.gmra.mxu1 %vm310_vm4, %v249_v12 }
  0xa8   : > { %528 = vmatmul.msk.f32.gmra.mxu3 %vm310_vm4, %v249_v12 }
 0x114   : > { %v334_v13 = vpop.f32.mrf.mxu0 }
 0x115   : > { %v335_v14 = vadd.f32 %v334_v13, %v306_v0 }
 0x11a   : > { %v380_v17 = vpop.f32.mrf.mxu2 }
 0x11b   : > { %v381_v23 = vadd.f32 %v380_v17, %v307_v19 }
 0x11c   : > { %v357_v15 = vpop.f32.mrf.mxu1  ;;  %v337_v21 = vpop.f32.mrf.mxu0 }
 0x11d   : > { %v358_v18 = vadd.f32 %v357_v15, %v335_v14  ;;  %v338_v24 = vadd.f32 %v337_v21, %v306_v0 }
 0x11f   : > { %vm410_vm5 = vcmp.gt.f32.partialorder %v358_v18, 0.0  ;;  %v415_v20 = vmul.f32 %v414_v16, %v358_v18 }
 0x121   : > { %v419_v22 = vsel %vm410_vm5, %v358_v18, %v415_v20 }
 0x122   : > { %423 = vst [vmem:[%s208_s29] sm:$0xff] %v419_v22 }
 0x123   : > { %v403_v25 = vpop.f32.mrf.mxu3  ;;  %v383_v30 = vpop.f32.mrf.mxu2 }
 0x124   : > { %v404_v26 = vadd.f32 %v403_v25, %v381_v23  ;;  %v360_v27 = vpop.f32.mrf.mxu1  ;;  %v384_v34 = vadd.f32 %v383_v30, %v307_v19 }
 0x125   : > { %v361_v28 = vadd.f32 %v360_v27, %v338_v24 }
 0x126   : > { %vm411_vm6 = vcmp.gt.f32.partialorder %v404_v26, 0.0  ;;  %v416_v29 = vmul.f32 %v414_v16, %v404_v26 }
 0x127   : > { %vm412_vm7 = vcmp.gt.f32.partialorder %v361_v28, 0.0  ;;  %v417_v31 = vmul.f32 %v414_v16, %v361_v28 }
 0x128   : > { %v420_v32 = vsel %vm411_vm6, %v404_v26, %v416_v29 }
 0x129   : > { %424 = vst [vmem:[%s208_s29 + $0x8] sm:$0xff] %v420_v32  ;;  %v421_v33 = vsel %vm412_vm7, %v361_v28, %v417_v31 }
 0x12a   : > { %425 = vst [vmem:[%s208_s29 + $0x10] sm:$0xff] %v421_v33 }
 0x12b   : > { %v406_v35 = vpop.f32.mrf.mxu3 }
 0x12c   : > { %v407_v36 = vadd.f32 %v406_v35, %v384_v34 }
 0x12e   : > { %vm413_vm8 = vcmp.gt.f32.partialorder %v407_v36, 0.0  ;;  %v418_v37 = vmul.f32 %v414_v16, %v407_v36 }
 0x130   : > { %v422_v38 = vsel %vm413_vm8, %v407_v36, %v418_v37 }
 0x131   : > { %426 = vst [vmem:[%s208_s29 + $0x18] sm:$0xff] %v422_v38 }
 0x132   : > { %648 = shalt.err (!%p645_p8)
}
 0x133   : > { %s694_s23 = smov 256  }
 0x134   : > { %540 = dma.vmem_to_hbm [thread:$0]  (%p761_p5), %s441_s8, 512, %s443_s9, %s428_s3, %s694_s23, %s694_s23, %s693_s15  }
 0x135 PF: > { %p552_p9 = scmp.ge.s32.totalorder %s687_s20, 2  ;;  %s457_s24 = sand.u32 1, %s675_s17  }
 0x136   : > { %s458_s28 = scalar_lea.sflag [#allocation5], %s457_s24 }
 0x137   : > { %p547_p10 = pnand %p552_p9, %p765_p6 }
 0x139   : > { %p548_p11 = pneg %p547_p10 }
 0x13b   : > { %670 = dma.done.wait (%p548_p11), %s458_s28, 512  }
 0x13c   : > { %672 = vsyncadd (%p548_p11), %s458_s28, 4294966784  ;;  %p16_p12 = scmp.ge.s32.totalorder %s748_s22, 4   ;;  %s845_s17 = smov %s679_s18 }
 0x13d   : > { %s846_s18 = smov %s683_s19  ;;  %s847_s19 = smov %s759_s25 }
 0x13e   : > { %s848_s20 = smov %s748_s22  ;;  %18 = sbr.rel (!%p16_p12) target bundleno = 6 (0x6), region = 76 }
 0x143   :  { %464 = vsyncpa [#allocation4], 1 }
 0x144   :  { %466 = vsyncpa [#allocation4 + $0x1], 1 }
 0x145   :  { %467 = vsyncpa [#allocation5], 1 }
 0x146   :  { %469 = vsyncpa [#allocation5 + $0x1], 1 }

</bundles_post_ra>
